<compile_context>
chip_gen: v7x
topology: tpu7x:2x2x1
jax: 0.10.0
libtpu: 0.0.40
codegen_flags: <defaults>
</compile_context>

<pallas_src>
import jax
import jax.numpy as jnp
from jax.experimental import pallas as pl
from jax.experimental.pallas import tpu as pltpu

D = 128  # fixed by the module: Linear(128, 128)


def _round_up(n, m):
    return ((n + m - 1) // m) * m


def unary128_kernel(x_ref, w_ref, b_ref, o_ref):
    # x_ref: (TB, 128), w_ref: (128, 128), b_ref: (1, 128), o_ref: (TB, 128)
    acc = jnp.dot(x_ref[...], w_ref[...], preferred_element_type=jnp.float32)
    acc = acc + b_ref[...].astype(jnp.float32)          # broadcast bias over rows
    # sigmoid(z) = 0.5 * tanh(z/2) + 0.5: one EUP push per vreg (vs exp+recip),
    # exact numerics; the 0.5 mul/add ride in idle VPU slots under the DMA stream.
    y = 0.5 * jnp.tanh(0.5 * acc) + 0.5
    o_ref[...] = y.astype(o_ref.dtype)


def _pick_tile(batch, requested):
    """Batch tile policy (rows, multiple of 8 sublanes).

    - Big tiles amortize the ~0.35 us per-grid-step overhead (HBM-streaming op).
    - For large batches force >= 4 grid steps so the two v7x TensorCores each
      get >= 2 steps (overlap); each step still covers >= ~1024 rows, so the
      extra steps are noise on single-TC v5e/v6e.
    - Small/medium batches: one tile (no forced split on single-TC chips).
    """
    tile = min(requested, _round_up(batch, 8))
    if batch >= 4 * 1024:
        tile = min(tile, _round_up(pl.cdiv(batch, 4), 8))
    return max(tile, 8)


def unary128(x, w_t, b, *, tile_b=4096):
    """x: (B, 128), w_t: (128, 128) [= W.T, i.e. (in, out)], b: (1, 128)."""
    B, d = x.shape
    assert d == D and w_t.shape == (D, D) and b.shape == (1, D)

    tb = _pick_tile(B, tile_b)
    grid = pl.cdiv(B, tb)

    in_item = jnp.dtype(x.dtype).itemsize
    w_item = jnp.dtype(w_t.dtype).itemsize
    cost = pl.CostEstimate(
        flops=2 * B * D * D,
        transcendentals=B * D,
        bytes_accessed=2 * B * D * in_item + (D * D + D) * w_item,
    )

    return pl.pallas_call(
        unary128_kernel,
        out_shape=jax.ShapeDtypeStruct((B, D), x.dtype),
        grid_spec=pltpu.PrefetchScalarGridSpec(
            num_scalar_prefetch=0,
            grid=(grid,),
            in_specs=[
                pl.BlockSpec((tb, D), lambda i: (i, 0)),   # x tile (streams)
                pl.BlockSpec((D, D), lambda i: (0, 0)),    # VMEM-resident weight
                pl.BlockSpec((1, D), lambda i: (0, 0)),    # VMEM-resident bias row
            ],
            out_specs=pl.BlockSpec((tb, D), lambda i: (i, 0)),
        ),
        compiler_params=pltpu.CompilerParams(
            dimension_semantics=("parallel",),
            vmem_limit_bytes=32 << 20,   # headroom for 4096-row f32 tiles on v5e
        ),
        cost_estimate=cost,
    )(x, w_t, b)


def unary128_ref(x, w_t, b):
    return jax.nn.sigmoid(x @ w_t + b)


if __name__ == "__main__":
    key = jax.random.PRNGKey(0)
    kx, kw, kb = jax.random.split(key, 3)

    # Small batch, deliberately not a multiple of the test tile so the partial
    # edge block (masked store, no host-side pad/slice) gets exercised.
    B = 200
    x = jax.random.normal(kx, (B, D), dtype=jnp.float32)

    # Deterministic "Linear(128, 128)" params (PyTorch stores W as (out, in);
    # the kernel consumes the transposed (in, out) form).
    w = jax.random.normal(kw, (D, D), dtype=jnp.float32) * 0.05   # (out, in)
    bias = jax.random.normal(kb, (D,), dtype=jnp.float32) * 0.05
    w_t = w.T                                                     # (in, out)
    b = bias.reshape(1, D)

    ref = unary128_ref(x, w_t, b)

    # 1) Default tile: whole batch in one block.
    out = unary128(x, w_t, b)
    jax.block_until_ready(out)
    assert out.shape == (B, D)
    assert jnp.allclose(out, ref, atol=1e-3, rtol=1e-3), float(
        jnp.max(jnp.abs(out - ref)))

    # 2) Small tile: multi-step grid with a partial (masked) edge block.
    out2 = unary128(x, w_t, b, tile_b=64)
    jax.block_until_ready(out2)
    assert jnp.allclose(out2, ref, atol=1e-3, rtol=1e-3), float(
        jnp.max(jnp.abs(out2 - ref)))

    print("KERNEL_OK")
</pallas_src>

<mosaic_0001>
module attributes {stable_mosaic.version = 11 : i64} {
  func.func @unary128_kernel(%arg0: i32, %arg1: memref<200x128xf32, #tpu.memory_space<vmem>>, %arg2: memref<128x128xf32, #tpu.memory_space<vmem>>, %arg3: memref<1x128xf32, #tpu.memory_space<vmem>>, %arg4: memref<200x128xf32, #tpu.memory_space<vmem>>) attributes {dimension_semantics = [#tpu.dimension_semantics<parallel>], iteration_bounds = array<i64: 1>, scalar_prefetch = 0 : i64, scratch_operands = 0 : i64, tpu.core_type = #tpu.core_type<tc>, window_params = [{transform_indices = @transform_0, window_bounds = array<i64: 200, 128>}, {pipeline_mode = #tpu.pipeline_mode<synchronous>, transform_indices = @transform_1, window_bounds = array<i64: 128, 128>}, {pipeline_mode = #tpu.pipeline_mode<synchronous>, transform_indices = @transform_2, window_bounds = array<i64: 1, 128>}, {transform_indices = @transform_3, window_bounds = array<i64: 200, 128>}]} {
    %c0 = arith.constant 0 : index
    %c0_0 = arith.constant 0 : index
    %0 = vector.load %arg1[%c0, %c0_0] : memref<200x128xf32, #tpu.memory_space<vmem>>, vector<200x128xf32>
    %c0_1 = arith.constant 0 : index
    %c0_2 = arith.constant 0 : index
    %1 = vector.load %arg2[%c0_1, %c0_2] : memref<128x128xf32, #tpu.memory_space<vmem>>, vector<128x128xf32>
    %cst = arith.constant dense<0.000000e+00> : vector<200x128xf32>
    %2 = tpu.matmul %0, %1, %cst {dimension_numbers = #tpu.dot_dimension_numbers<[1], [0], [0], [1], [0, 0, 1, 1], [], []>} : vector<200x128xf32>, vector<128x128xf32>, vector<200x128xf32> -> vector<200x128xf32>
    %c0_3 = arith.constant 0 : index
    %c0_4 = arith.constant 0 : index
    %3 = vector.load %arg3[%c0_3, %c0_4] : memref<1x128xf32, #tpu.memory_space<vmem>>, vector<1x128xf32>
    %4 = vector.broadcast %3 : vector<1x128xf32> to vector<200x128xf32>
    %5 = arith.addf %2, %4 : vector<200x128xf32>
    %cst_5 = arith.constant 5.000000e-01 : f32
    %6 = vector.broadcast %cst_5 : f32 to vector<200x128xf32>
    %7 = arith.mulf %6, %5 : vector<200x128xf32>
    %8 = math.tanh %7 : vector<200x128xf32>
    %cst_6 = arith.constant 5.000000e-01 : f32
    %9 = vector.broadcast %cst_6 : f32 to vector<200x128xf32>
    %10 = arith.mulf %9, %8 : vector<200x128xf32>
    %cst_7 = arith.constant 5.000000e-01 : f32
    %11 = vector.broadcast %cst_7 : f32 to vector<200x128xf32>
    %12 = arith.addf %10, %11 : vector<200x128xf32>
    %c0_8 = arith.constant 0 : index
    %c0_9 = arith.constant 0 : index
    %13 = vector.load %arg4[%c0_8, %c0_9] : memref<200x128xf32, #tpu.memory_space<vmem>>, vector<200x128xf32>
    tpu.vector_store %arg4[%c0_8, %c0_9], %12 {strides = array<i32>} : memref<200x128xf32, #tpu.memory_space<vmem>>, vector<200x128xf32>,
    return
  }
  func.func @transform_0(%arg0: i32) -> (i32, i32) {
    %c0_i32 = arith.constant 0 : i32
    %c0_i32_0 = arith.constant 0 : i32
    return %arg0, %c0_i32 : i32, i32
  }
  func.func @transform_1(%arg0: i32) -> (i32, i32) {
    %c0_i32 = arith.constant 0 : i32
    %c0_i32_0 = arith.constant 0 : i32
    %c0_i32_1 = arith.constant 0 : i32
    return %c0_i32, %c0_i32_0 : i32, i32
  }
  func.func @transform_2(%arg0: i32) -> (i32, i32) {
    %c0_i32 = arith.constant 0 : i32
    %c0_i32_0 = arith.constant 0 : i32
    %c0_i32_1 = arith.constant 0 : i32
    return %c0_i32, %c0_i32_0 : i32, i32
  }
  func.func @transform_3(%arg0: i32) -> (i32, i32) {
    %c0_i32 = arith.constant 0 : i32
    %c0_i32_0 = arith.constant 0 : i32
    return %arg0, %c0_i32 : i32, i32
  }
}

</mosaic_0001>

<bundles_post_ra>
// kernel: tpu_custom_call.1
= control target key start
LH: loop header
LB: loop body
LE: loop exit
PB: predicated region body
PF: predicated region fallthrough
CT: control target
= control target key end

     0   :  { %8 = vsyncpa [#allocation3], 0  ;;  %s896_s0 = inlined_call_operand.hbm [shape: f32[200,128], index: 0, kind: input, shape index: {}]   ;;  %s897_s1 = inlined_call_operand.hbm [shape: f32[128,128], index: 1, kind: input, shape index: {}]   ;;  %s898_s2 = inlined_call_operand.vmem [shape: f32[1,128], index: 2, kind: input, shape index: {}]   ;;  %s899_s3 = inlined_call_operand.hbm [shape: f32[200,128], index: 3, kind: output, shape index: {}]  }
   0x1   :  { %9 = vsyncpa [#allocation6], 0 }
   0x2   :  { %10 = vsyncpa [#allocation4], 0  ;;  %s743_s12 = smov [#allocation2]   ;;  %s671_s16 = scalar_lea.hbm %s896_s0, 3200 }
   0x3   :  { %s16_s13 = sshll.u32 %s743_s12, 4  ;;  %p672_p0 = scmp.ne.s32.totalorder %s896_s0, %s671_s16  ;;  %s17_s13 = int_to_ptr.vmem [resolvable:$true] %s16_s13 }
   0x4   :  { %p675_p1 = scmp.lt.u32.totalorder %s671_s16, %s896_s0 }
   0x6   :  { %p677_p2 = pnand %p675_p1, %p672_p0 }
   0x8   :  { %680 = shalt.err (!%p677_p2)
}
   0x9   :  { %s681_s21 = scalar_lea.vmem %s17_s13, 3200  ;;  %p686_p4 = scmp.lt.s32.totalorder %s17_s13, %s17_s13 }
   0xa   :  { %p682_p3 = scmp.ne.s32.totalorder %s17_s13, %s681_s21  ;;  %p687_p5 = scmp.lt.s32.totalorder %s681_s21, %s681_s21 }
   0xc   :  { %p688_p6 = por %p687_p5, %p686_p4 }
   0xe   :  { %p689_p7 = pnand %p688_p6, %p682_p3 }
  0x10   :  { %692 = shalt.err (!%p689_p7)
}
  0x11   :  { %s744_s22 = smov 128   ;;  %s745_s23 = smov 8  }
  0x12   :  { %22 = dma.hbm_to_vmem [thread:$0]  %s896_s0, 3200, %s17_s13, [#allocation3], %s744_s22, %s744_s22, %s745_s23  }
  0x13   :  { %s746_s26 = smov [#allocation5]   ;;  %s693_s30 = scalar_lea.hbm %s897_s1, 2048 }
  0x14   :  { %s28_s27 = sshll.u32 %s746_s26, 4  ;;  %p694_p8 = scmp.ne.s32.totalorder %s897_s1, %s693_s30  ;;  %s29_s27 = int_to_ptr.vmem [resolvable:$true] %s28_s27 }
  0x15   :  { %p697_p9 = scmp.lt.u32.totalorder %s693_s30, %s897_s1 }
  0x17   :  { %p699_p10 = pnand %p697_p9, %p694_p8 }
  0x19   :  { %702 = shalt.err (!%p699_p10)
}
  0x1a   :  { %s703_s8 = scalar_lea.vmem %s29_s27, 2048  ;;  %p708_p12 = scmp.lt.s32.totalorder %s29_s27, %s29_s27 }
  0x1b   :  { %p704_p11 = scmp.ne.s32.totalorder %s29_s27, %s703_s8  ;;  %p709_p13 = scmp.lt.s32.totalorder %s703_s8, %s703_s8 }
  0x1d   :  { %p710_p0 = por %p709_p13, %p708_p12 }
  0x1f   :  { %p711_p1 = pnand %p710_p0, %p704_p11 }
  0x21   :  { %714 = shalt.err (!%p711_p1)
}
  0x22   :  { %34 = dma.hbm_to_vmem [thread:$0]  %s897_s1, 2048, %s29_s27, [#allocation6], %s744_s22, %s744_s22, %s745_s23  }
  0x23   :  { %737 = dma.done.wait [#allocation3], 3200  }
  0x24   :  { %738 = vsyncadd [#allocation3], 4294964096 }
  0x25   :  { %739 = dma.done.wait [#allocation6], 2048  }
  0x26   :  { %740 = vsyncadd [#allocation6], 4294965248  ;;  %v747_v0 = vmov 0.0|0.0   ;;  %vm748_vm0 = vmmov 0   ;;  %v749_v1 = vmov 0.0   ;;  %v68_v2 = vld [vmem:[#allocation5] sm:$0xff] }
  0x27   :  { %573 = vmatprep.subr.bf16.mxu0 %v747_v0  ;;  %597 = vmatprep.subr.bf16.mxu1 %v747_v0  ;;  %v69_v3 = vld [vmem:[#allocation5 + $0x8] sm:$0xff]  ;;  %v70_v4 = vld [vmem:[#allocation5 + $0x10] sm:$0xff]  ;;  %v71_v6 = vld [vmem:[#allocation5 + $0x18] sm:$0xff] }
  0x28   :  { %498 = vmatprep.mubr.msk.f32.mxu0 %vm748_vm0, %v749_v1  ;;  %537 = vmatprep.mubr.msk.f32.mxu1 %vm748_vm0, %v749_v1  ;;  %v574_v5 = vpack.c.bf16 %v69_v3, %v68_v2  ;;  %v577_v7 = vpack.c.bf16 %v71_v6, %v70_v4  ;;  %v72_v8 = vld [vmem:[#allocation5 + $0x20] sm:$0xff]  ;;  %v73_v9 = vld [vmem:[#allocation5 + $0x28] sm:$0xff]  ;;  %v74_v11 = vld [vmem:[#allocation5 + $0x30] sm:$0xff] }
  0x29   :  { %v580_v10 = vpack.c.bf16 %v73_v9, %v72_v8  ;;  %v75_v12 = vld [vmem:[#allocation5 + $0x38] sm:$0xff]  ;;  %v76_v14 = vld [vmem:[#allocation5 + $0x40] sm:$0xff]  ;;  %v77_v15 = vld [vmem:[#allocation5 + $0x48] sm:$0xff] }
  0x2a   :  { %575 = vmatpush3.bf16.msra.mxu0 %v574_v5  ;;  %605 = vmatpush3.bf16.msra.mxu1 %v574_v5  ;;  %v583_v13 = vpack.c.bf16 %v75_v12, %v74_v11  ;;  %v586_v16 = vpack.c.bf16 %v77_v15, %v76_v14  ;;  %v78_v17 = vld [vmem:[#allocation5 + $0x50] sm:$0xff]  ;;  %v79_v18 = vld [vmem:[#allocation5 + $0x58] sm:$0xff]  ;;  %v80_v20 = vld [vmem:[#allocation5 + $0x60] sm:$0xff] }
  0x2b   :  { %576 = vmatprep.subr.bf16.mxu0 %v747_v0  ;;  %598 = vmatprep.subr.bf16.mxu1 %v747_v0  ;;  %v589_v19 = vpack.c.bf16 %v79_v18, %v78_v17  ;;  %v81_v21 = vld [vmem:[#allocation5 + $0x68] sm:$0xff]  ;;  %v82_v23 = vld [vmem:[#allocation5 + $0x70] sm:$0xff]  ;;  %v83_v24 = vld [vmem:[#allocation5 + $0x78] sm:$0xff] }
  0x2c   :  { %v592_v22 = vpack.c.bf16 %v81_v21, %v80_v20  ;;  %v595_v25 = vpack.c.bf16 %v83_v24, %v82_v23  ;;  %v43_v26 = vld [vmem:[#allocation2] sm:$0xff]  ;;  %v56_v27 = vld [vmem:[#allocation2 + $0x68] sm:$0xff]  ;;  %v57_v29 = vld [vmem:[#allocation2 + $0x70] sm:$0xff] }
  0x2d   :  { %v44_v28 = vld [vmem:[#allocation2 + $0x8] sm:$0xff]  ;;  %v45_v30 = vld [vmem:[#allocation2 + $0x10] sm:$0xff]  ;;  %v58_v31 = vld [vmem:[#allocation2 + $0x78] sm:$0xff] }
  0x2e   :  { %578 = vmatpush3.bf16.msra.mxu0 %v577_v7  ;;  %606 = vmatpush3.bf16.msra.mxu1 %v577_v7  ;;  %v46_v32 = vld [vmem:[#allocation2 + $0x18] sm:$0xff]  ;;  %v59_v33 = vld [vmem:[#allocation2 + $0x80] sm:$0xff]  ;;  %v60_v35 = vld [vmem:[#allocation2 + $0x88] sm:$0xff] }
  0x2f   :  { %579 = vmatprep.subr.bf16.mxu0 %v747_v0  ;;  %599 = vmatprep.subr.bf16.mxu1 %v747_v0  ;;  %v47_v34 = vld [vmem:[#allocation2 + $0x20] sm:$0xff]  ;;  %v48_v36 = vld [vmem:[#allocation2 + $0x28] sm:$0xff]  ;;  %v61_v37 = vld [vmem:[#allocation2 + $0x90] sm:$0xff] }
  0x30   :  { %v49_v38 = vld [vmem:[#allocation2 + $0x30] sm:$0xff]  ;;  %v62_v39 = vld [vmem:[#allocation2 + $0x98] sm:$0xff]  ;;  %v63_v41 = vld [vmem:[#allocation2 + $0xa0] sm:$0xff] }
  0x31   :  { %v50_v40 = vld [vmem:[#allocation2 + $0x38] sm:$0xff]  ;;  %v51_v42 = vld [vmem:[#allocation2 + $0x40] sm:$0xff]  ;;  %v64_v43 = vld [vmem:[#allocation2 + $0xa8] sm:$0xff] }
  0x32   :  { %581 = vmatpush3.bf16.msra.mxu0 %v580_v10  ;;  %607 = vmatpush3.bf16.msra.mxu1 %v580_v10  ;;  %v52_v44 = vld [vmem:[#allocation2 + $0x48] sm:$0xff]  ;;  %v65_v45 = vld [vmem:[#allocation2 + $0xb0] sm:$0xff]  ;;  %v66_v47 = vld [vmem:[#allocation2 + $0xb8] sm:$0xff] }
  0x33   :  { %582 = vmatprep.subr.bf16.mxu0 %v747_v0  ;;  %600 = vmatprep.subr.bf16.mxu1 %v747_v0  ;;  %v53_v46 = vld [vmem:[#allocation2 + $0x50] sm:$0xff]  ;;  %v54_v48 = vld [vmem:[#allocation2 + $0x58] sm:$0xff]  ;;  %v67_v49 = vld [vmem:[#allocation2 + $0xc0] sm:$0xff] }
  0x34   :  { %v55_v50 = vld [vmem:[#allocation2 + $0x60] sm:$0xff] }
  0x35   :  { %v854_v51 = vld [vmem:[%s898_s2] ss:$0 sm:$0xff]  ;;  %s750_s2 = smov [#allocation7]  }
  0x36   :  { %584 = vmatpush3.bf16.msra.mxu0 %v583_v13  ;;  %608 = vmatpush3.bf16.msra.mxu1 %v583_v13  ;;  %s411_s11 = sshll.u32 %s750_s2, 4  ;;  %s412_s11 = int_to_ptr.vmem [resolvable:$true] %s411_s11 }
  0x37   :  { %585 = vmatprep.subr.bf16.mxu0 %v747_v0  ;;  %601 = vmatprep.subr.bf16.mxu1 %v747_v0  ;;  %s715_s12 = scalar_lea.vmem %s412_s11, 3200  ;;  %p720_p3 = scmp.lt.s32.totalorder %s412_s11, %s412_s11 }
  0x38   :  { %p716_p2 = scmp.ne.s32.totalorder %s412_s11, %s715_s12  ;;  %p721_p4 = scmp.lt.s32.totalorder %s715_s12, %s715_s12 }
  0x3a   :  { %587 = vmatpush3.bf16.msra.mxu0 %v586_v16  ;;  %609 = vmatpush3.bf16.msra.mxu1 %v586_v16  ;;  %p722_p5 = por %p721_p4, %p720_p3 }
  0x3b   :  { %588 = vmatprep.subr.bf16.mxu0 %v747_v0  ;;  %602 = vmatprep.subr.bf16.mxu1 %v747_v0 }
  0x3c   :  { %p723_p6 = pnand %p722_p5, %p716_p2 }
  0x3e   :  { %590 = vmatpush3.bf16.msra.mxu0 %v589_v19  ;;  %610 = vmatpush3.bf16.msra.mxu1 %v589_v19 }
  0x3f   :  { %591 = vmatprep.subr.bf16.mxu0 %v747_v0  ;;  %603 = vmatprep.subr.bf16.mxu1 %v747_v0 }
  0x42   :  { %593 = vmatpush3.bf16.msra.mxu0 %v592_v22  ;;  %611 = vmatpush3.bf16.msra.mxu1 %v592_v22 }
  0x43   :  { %594 = vmatprep.subr.bf16.mxu0 %v747_v0  ;;  %604 = vmatprep.subr.bf16.mxu1 %v747_v0 }
  0x46   :  { %596 = vmatpush3.bf16.msra.mxu0 %v595_v25  ;;  %612 = vmatpush3.bf16.msra.mxu1 %v595_v25 }
  0x49   :  { %499 = vmatmul.mubr.f32.vlgmr.msra.gmra.mrb[0].mxu0 %v43_v26  ;;  %538 = vmatmul.mubr.f32.vlgmr.msra.gmra.mrb[0].mxu1 %v56_v27 }
  0x4a   :  { %501 = vmatprep.mubr.msk.f32.mxu0 %vm748_vm0, %v749_v1  ;;  %540 = vmatprep.mubr.msk.f32.mxu1 %vm748_vm0, %v749_v1 }
  0x4d   :  { %502 = vmatmul.mubr.f32.gmra.mrb[2].mxu0 %v44_v28  ;;  %541 = vmatmul.mubr.f32.gmra.mrb[2].mxu1 %v57_v29 }
  0x4e   :  { %504 = vmatprep.mubr.msk.f32.mxu0 %vm748_vm0, %v749_v1  ;;  %543 = vmatprep.mubr.msk.f32.mxu1 %vm748_vm0, %v749_v1 }
  0x51   :  { %505 = vmatmul.mubr.f32.gmra.mrb[4].mxu0 %v45_v30  ;;  %544 = vmatmul.mubr.f32.gmra.mrb[4].mxu1 %v58_v31 }
  0x52   :  { %507 = vmatprep.mubr.msk.f32.mxu0 %vm748_vm0, %v749_v1  ;;  %546 = vmatprep.mubr.msk.f32.mxu1 %vm748_vm0, %v749_v1 }
  0x55   :  { %508 = vmatmul.mubr.f32.gmra.mrb[6].mxu0 %v46_v32  ;;  %547 = vmatmul.mubr.f32.gmra.mrb[6].mxu1 %v59_v33 }
  0x56   :  { %510 = vmatprep.mubr.msk.f32.mxu0 %vm748_vm0, %v749_v1  ;;  %549 = vmatprep.mubr.msk.f32.mxu1 %vm748_vm0, %v749_v1 }
  0x59   :  { %511 = vmatmul.mubr.f32.gmra.mrb[8].mxu0 %v47_v34  ;;  %550 = vmatmul.mubr.f32.gmra.mrb[8].mxu1 %v60_v35 }
  0x5a   :  { %513 = vmatprep.mubr.msk.f32.mxu0 %vm748_vm0, %v749_v1  ;;  %552 = vmatprep.mubr.msk.f32.mxu1 %vm748_vm0, %v749_v1 }
  0x5d   :  { %514 = vmatmul.mubr.f32.gmra.mrb[10].mxu0 %v48_v36  ;;  %553 = vmatmul.mubr.f32.gmra.mrb[10].mxu1 %v61_v37 }
  0x5e   :  { %516 = vmatprep.mubr.msk.f32.mxu0 %vm748_vm0, %v749_v1  ;;  %555 = vmatprep.mubr.msk.f32.mxu1 %vm748_vm0, %v749_v1 }
  0x61   :  { %517 = vmatmul.mubr.f32.gmra.mrb[12].mxu0 %v49_v38  ;;  %556 = vmatmul.mubr.f32.gmra.mrb[12].mxu1 %v62_v39 }
  0x62   :  { %519 = vmatprep.mubr.msk.f32.mxu0 %vm748_vm0, %v749_v1  ;;  %558 = vmatprep.mubr.msk.f32.mxu1 %vm748_vm0, %v749_v1 }
  0x65   :  { %520 = vmatmul.mubr.f32.gmra.mrb[14].mxu0 %v50_v40  ;;  %559 = vmatmul.mubr.f32.gmra.mrb[14].mxu1 %v63_v41 }
  0x66   :  { %522 = vmatprep.mubr.msk.f32.mxu0 %vm748_vm0, %v749_v1  ;;  %561 = vmatprep.mubr.msk.f32.mxu1 %vm748_vm0, %v749_v1 }
  0x69   :  { %523 = vmatmul.mubr.f32.gmra.mrb[16].mxu0 %v51_v42  ;;  %562 = vmatmul.mubr.f32.gmra.mrb[16].mxu1 %v64_v43 }
  0x6a   :  { %525 = vmatprep.mubr.msk.f32.mxu0 %vm748_vm0, %v749_v1  ;;  %564 = vmatprep.mubr.msk.f32.mxu1 %vm748_vm0, %v749_v1 }
  0x6d   :  { %526 = vmatmul.mubr.f32.gmra.mrb[18].mxu0 %v52_v44  ;;  %565 = vmatmul.mubr.f32.gmra.mrb[18].mxu1 %v65_v45 }
  0x6e   :  { %528 = vmatprep.mubr.msk.f32.mxu0 %vm748_vm0, %v749_v1  ;;  %567 = vmatprep.mubr.msk.f32.mxu1 %vm748_vm0, %v749_v1 }
  0x71   :  { %529 = vmatmul.mubr.f32.gmra.mrb[20].mxu0 %v53_v46  ;;  %568 = vmatmul.mubr.f32.gmra.mrb[20].mxu1 %v66_v47 }
  0x72   :  { %531 = vmatprep.mubr.msk.f32.mxu0 %vm748_vm0, %v749_v1  ;;  %570 = vmatprep.mubr.msk.f32.mxu1 %vm748_vm0, %v749_v1 }
  0x75   :  { %532 = vmatmul.mubr.f32.gmra.mrb[22].mxu0 %v54_v48  ;;  %571 = vmatmul.mubr.f32.gmra.mrb[22].mxu1 %v67_v49 }
  0x76   :  { %534 = vmatprep.mubr.msk.f32.mxu0 %vm748_vm0, %v749_v1 }
  0x79   :  { %535 = vmatmul.mubr.f32.gmra.mrb[24].mxu0 %v55_v50 }
 0x11c   :  { %v157_v52 = vpop.f32.mrb[0].mxu0  ;;  %v222_v53 = vpop.f32.mrb[0].mxu1 }
 0x11d   :  { %v158_v54 = vadd.f32 %v854_v51, %v157_v52  ;;  %v500_v55 = vpop.f32.mrb[1].mxu0  ;;  %v223_v56 = vadd.f32 %v854_v51, %v222_v53  ;;  %v539_v57 = vpop.f32.mrb[1].mxu1 }
 0x11f   :  { %v281_v58 = vmul.f32 0.5, %v158_v54  ;;  %v294_v59 = vmul.f32 0.5, %v223_v56 }
 0x120   :  { %v162_v60 = vpop.f32.mrb[2].mxu0  ;;  %v227_v61 = vpop.f32.mrb[2].mxu1 }
 0x121   :  { %621 = vtanh.f32 %v281_v58  ;;  %v163_v62 = vadd.f32 %v854_v51, %v162_v60  ;;  %v503_v63 = vpop.f32.mrb[3].mxu0  ;;  %v228_v0 = vadd.f32 %v854_v51, %v227_v61  ;;  %v542_v1 = vpop.f32.mrb[3].mxu1 }
 0x122   :  { %623 = vtanh.f32 %v294_v59 }
 0x123   :  { %v282_v2 = vmul.f32 0.5, %v163_v62  ;;  %v295_v3 = vmul.f32 0.5, %v228_v0 }
 0x124   :  { %v167_v4 = vpop.f32.mrb[4].mxu0  ;;  %v232_v5 = vpop.f32.mrb[4].mxu1 }
 0x125   :  { %625 = vtanh.f32 %v282_v2  ;;  %v168_v6 = vadd.f32 %v854_v51, %v167_v4  ;;  %v506_v7 = vpop.f32.mrb[5].mxu0  ;;  %v233_v8 = vadd.f32 %v854_v51, %v232_v5  ;;  %v545_v9 = vpop.f32.mrb[5].mxu1 }
 0x126   :  { %627 = vtanh.f32 %v295_v3 }
 0x127   :  { %v283_v10 = vmul.f32 0.5, %v168_v6  ;;  %v296_v11 = vmul.f32 0.5, %v233_v8 }
 0x128   :  { %v172_v12 = vpop.f32.mrb[6].mxu0  ;;  %v237_v13 = vpop.f32.mrb[6].mxu1 }
 0x129   :  { %629 = vtanh.f32 %v283_v10  ;;  %v173_v14 = vadd.f32 %v854_v51, %v172_v12  ;;  %v509_v15 = vpop.f32.mrb[7].mxu0  ;;  %v238_v16 = vadd.f32 %v854_v51, %v237_v13  ;;  %v548_v17 = vpop.f32.mrb[7].mxu1 }
 0x12a   :  { %631 = vtanh.f32 %v296_v11 }
 0x12b   :  { %v622_v18 = vpop.eup %621  ;;  %v284_v19 = vmul.f32 0.5, %v173_v14  ;;  %v297_v20 = vmul.f32 0.5, %v238_v16 }
 0x12c   :  { %v624_v21 = vpop.eup %623  ;;  %v331_v22 = vmul.f32 0.5, %v622_v18  ;;  %v177_v23 = vpop.f32.mrb[8].mxu0 }
 0x12d   :  { %v242_v24 = vpop.f32.mrb[8].mxu1  ;;  %v344_v25 = vmul.f32 0.5, %v624_v21  ;;  %633 = vtanh.f32 %v284_v19  ;;  %v178_v26 = vadd.f32 %v854_v51, %v177_v23  ;;  %v512_v27 = vpop.f32.mrb[9].mxu0 }
 0x12e   :  { %v243_v28 = vadd.f32 %v854_v51, %v242_v24  ;;  %v551_v29 = vpop.f32.mrb[9].mxu1  ;;  %v356_v30 = vadd.f32 0.5, %v331_v22  ;;  %635 = vtanh.f32 %v297_v20 }
 0x12f   :  { %v626_v31 = vpop.eup %625  ;;  %v369_v32 = vadd.f32 0.5, %v344_v25  ;;  %v285_v33 = vmul.f32 0.5, %v178_v26 }
 0x130   :  { %v298_v34 = vmul.f32 0.5, %v243_v28  ;;  %v628_v35 = vpop.eup %627  ;;  %381 = vst [vmem:[#allocation7] sm:$0xff] %v356_v30  ;;  %v332_v36 = vmul.f32 0.5, %v626_v31  ;;  %v182_v37 = vpop.f32.mrb[10].mxu0 }
 0x131   :  { %v247_v38 = vpop.f32.mrb[10].mxu1  ;;  %394 = vst [vmem:[#allocation7 + $0x68] sm:$0xff] %v369_v32  ;;  %v345_v39 = vmul.f32 0.5, %v628_v35  ;;  %637 = vtanh.f32 %v285_v33  ;;  %v183_v40 = vadd.f32 %v854_v51, %v182_v37  ;;  %v515_v41 = vpop.f32.mrb[11].mxu0 }
 0x132   :  { %v248_v42 = vadd.f32 %v854_v51, %v247_v38  ;;  %v554_v43 = vpop.f32.mrb[11].mxu1  ;;  %v357_v44 = vadd.f32 0.5, %v332_v36  ;;  %639 = vtanh.f32 %v298_v34 }
 0x133   :  { %v630_v45 = vpop.eup %629  ;;  %v370_v46 = vadd.f32 0.5, %v345_v39  ;;  %v286_v47 = vmul.f32 0.5, %v183_v40 }
 0x134   :  { %v299_v48 = vmul.f32 0.5, %v248_v42  ;;  %v632_v49 = vpop.eup %631  ;;  %382 = vst [vmem:[#allocation7 + $0x8] sm:$0xff] %v357_v44  ;;  %v333_v50 = vmul.f32 0.5, %v630_v45  ;;  %v187_v52 = vpop.f32.mrb[12].mxu0 }
 0x135   :  { %v252_v53 = vpop.f32.mrb[12].mxu1  ;;  %395 = vst [vmem:[#allocation7 + $0x70] sm:$0xff] %v370_v46  ;;  %v346_v54 = vmul.f32 0.5, %v632_v49  ;;  %641 = vtanh.f32 %v286_v47  ;;  %v188_v55 = vadd.f32 %v854_v51, %v187_v52  ;;  %v518_v56 = vpop.f32.mrb[13].mxu0 }
 0x136   :  { %v253_v57 = vadd.f32 %v854_v51, %v252_v53  ;;  %v557_v58 = vpop.f32.mrb[13].mxu1  ;;  %v358_v59 = vadd.f32 0.5, %v333_v50  ;;  %643 = vtanh.f32 %v299_v48 }
 0x137   :  { %v634_v60 = vpop.eup %633  ;;  %v371_v61 = vadd.f32 0.5, %v346_v54  ;;  %v287_v62 = vmul.f32 0.5, %v188_v55 }
 0x138   :  { %v300_v63 = vmul.f32 0.5, %v253_v57  ;;  %v636_v0 = vpop.eup %635  ;;  %383 = vst [vmem:[#allocation7 + $0x10] sm:$0xff] %v358_v59  ;;  %v334_v1 = vmul.f32 0.5, %v634_v60  ;;  %v192_v2 = vpop.f32.mrb[14].mxu0 }
 0x139   :  { %v257_v3 = vpop.f32.mrb[14].mxu1  ;;  %396 = vst [vmem:[#allocation7 + $0x78] sm:$0xff] %v371_v61  ;;  %v347_v4 = vmul.f32 0.5, %v636_v0  ;;  %645 = vtanh.f32 %v287_v62  ;;  %v193_v5 = vadd.f32 %v854_v51, %v192_v2  ;;  %v521_v6 = vpop.f32.mrb[15].mxu0 }
 0x13a   :  { %v258_v7 = vadd.f32 %v854_v51, %v257_v3  ;;  %v560_v8 = vpop.f32.mrb[15].mxu1  ;;  %v359_v9 = vadd.f32 0.5, %v334_v1  ;;  %647 = vtanh.f32 %v300_v63 }
 0x13b   :  { %v638_v10 = vpop.eup %637  ;;  %v372_v11 = vadd.f32 0.5, %v347_v4  ;;  %v288_v12 = vmul.f32 0.5, %v193_v5 }
 0x13c   :  { %v301_v13 = vmul.f32 0.5, %v258_v7  ;;  %v640_v14 = vpop.eup %639  ;;  %384 = vst [vmem:[#allocation7 + $0x18] sm:$0xff] %v359_v9  ;;  %v335_v15 = vmul.f32 0.5, %v638_v10  ;;  %v197_v16 = vpop.f32.mrb[16].mxu0 }
 0x13d   :  { %v262_v17 = vpop.f32.mrb[16].mxu1  ;;  %397 = vst [vmem:[#allocation7 + $0x80] sm:$0xff] %v372_v11  ;;  %v348_v18 = vmul.f32 0.5, %v640_v14  ;;  %649 = vtanh.f32 %v288_v12  ;;  %v198_v19 = vadd.f32 %v854_v51, %v197_v16  ;;  %v524_v20 = vpop.f32.mrb[17].mxu0 }
 0x13e   :  { %v263_v21 = vadd.f32 %v854_v51, %v262_v17  ;;  %v563_v22 = vpop.f32.mrb[17].mxu1  ;;  %v360_v23 = vadd.f32 0.5, %v335_v15  ;;  %651 = vtanh.f32 %v301_v13 }
 0x13f   :  { %v642_v24 = vpop.eup %641  ;;  %v373_v25 = vadd.f32 0.5, %v348_v18  ;;  %v289_v26 = vmul.f32 0.5, %v198_v19 }
 0x140   :  { %v302_v27 = vmul.f32 0.5, %v263_v21  ;;  %v644_v28 = vpop.eup %643  ;;  %385 = vst [vmem:[#allocation7 + $0x20] sm:$0xff] %v360_v23  ;;  %v336_v29 = vmul.f32 0.5, %v642_v24  ;;  %v202_v30 = vpop.f32.mrb[18].mxu0 }
 0x141   :  { %v267_v31 = vpop.f32.mrb[18].mxu1  ;;  %398 = vst [vmem:[#allocation7 + $0x88] sm:$0xff] %v373_v25  ;;  %v349_v32 = vmul.f32 0.5, %v644_v28  ;;  %653 = vtanh.f32 %v289_v26  ;;  %v203_v33 = vadd.f32 %v854_v51, %v202_v30  ;;  %v527_v34 = vpop.f32.mrb[19].mxu0 }
 0x142   :  { %v268_v35 = vadd.f32 %v854_v51, %v267_v31  ;;  %v566_v36 = vpop.f32.mrb[19].mxu1  ;;  %v361_v37 = vadd.f32 0.5, %v336_v29  ;;  %655 = vtanh.f32 %v302_v27 }
 0x143   :  { %v646_v38 = vpop.eup %645  ;;  %v374_v39 = vadd.f32 0.5, %v349_v32  ;;  %v290_v40 = vmul.f32 0.5, %v203_v33 }
 0x144   :  { %v303_v41 = vmul.f32 0.5, %v268_v35  ;;  %v648_v42 = vpop.eup %647  ;;  %386 = vst [vmem:[#allocation7 + $0x28] sm:$0xff] %v361_v37  ;;  %v337_v43 = vmul.f32 0.5, %v646_v38  ;;  %v207_v44 = vpop.f32.mrb[20].mxu0 }
 0x145   :  { %v272_v45 = vpop.f32.mrb[20].mxu1  ;;  %399 = vst [vmem:[#allocation7 + $0x90] sm:$0xff] %v374_v39  ;;  %v350_v46 = vmul.f32 0.5, %v648_v42  ;;  %657 = vtanh.f32 %v290_v40  ;;  %v208_v47 = vadd.f32 %v854_v51, %v207_v44  ;;  %v530_v48 = vpop.f32.mrb[21].mxu0 }
 0x146   :  { %v273_v49 = vadd.f32 %v854_v51, %v272_v45  ;;  %v569_v50 = vpop.f32.mrb[21].mxu1  ;;  %v362_v52 = vadd.f32 0.5, %v337_v43  ;;  %659 = vtanh.f32 %v303_v41 }
 0x147   :  { %v650_v53 = vpop.eup %649  ;;  %v375_v54 = vadd.f32 0.5, %v350_v46  ;;  %v291_v55 = vmul.f32 0.5, %v208_v47 }
 0x148   :  { %v304_v56 = vmul.f32 0.5, %v273_v49  ;;  %v652_v57 = vpop.eup %651  ;;  %387 = vst [vmem:[#allocation7 + $0x30] sm:$0xff] %v362_v52  ;;  %v338_v58 = vmul.f32 0.5, %v650_v53  ;;  %v212_v59 = vpop.f32.mrb[22].mxu0 }
 0x149   :  { %v277_v60 = vpop.f32.mrb[22].mxu1  ;;  %400 = vst [vmem:[#allocation7 + $0x98] sm:$0xff] %v375_v54  ;;  %v351_v61 = vmul.f32 0.5, %v652_v57  ;;  %661 = vtanh.f32 %v291_v55  ;;  %v213_v62 = vadd.f32 %v854_v51, %v212_v59  ;;  %v533_v63 = vpop.f32.mrb[23].mxu0 }
 0x14a   :  { %v278_v0 = vadd.f32 %v854_v51, %v277_v60  ;;  %v572_v1 = vpop.f32.mrb[23].mxu1  ;;  %v363_v2 = vadd.f32 0.5, %v338_v58  ;;  %663 = vtanh.f32 %v304_v56 }
 0x14b   :  { %v654_v3 = vpop.eup %653  ;;  %v376_v4 = vadd.f32 0.5, %v351_v61  ;;  %v292_v5 = vmul.f32 0.5, %v213_v62 }
 0x14c   :  { %v305_v6 = vmul.f32 0.5, %v278_v0  ;;  %v656_v7 = vpop.eup %655  ;;  %388 = vst [vmem:[#allocation7 + $0x38] sm:$0xff] %v363_v2  ;;  %v339_v8 = vmul.f32 0.5, %v654_v3  ;;  %v217_v9 = vpop.f32.mrb[24].mxu0 }
 0x14d   :  { %401 = vst [vmem:[#allocation7 + $0xa0] sm:$0xff] %v376_v4  ;;  %v352_v10 = vmul.f32 0.5, %v656_v7  ;;  %665 = vtanh.f32 %v292_v5  ;;  %v218_v11 = vadd.f32 %v854_v51, %v217_v9  ;;  %v536_v12 = vpop.f32.mrb[25].mxu0 }
 0x14e   :  { %v364_v13 = vadd.f32 0.5, %v339_v8  ;;  %667 = vtanh.f32 %v305_v6 }
 0x14f   :  { %v658_v14 = vpop.eup %657  ;;  %v377_v15 = vadd.f32 0.5, %v352_v10  ;;  %v293_v16 = vmul.f32 0.5, %v218_v11 }
 0x150   :  { %v660_v17 = vpop.eup %659  ;;  %389 = vst [vmem:[#allocation7 + $0x40] sm:$0xff] %v364_v13  ;;  %v340_v18 = vmul.f32 0.5, %v658_v14 }
 0x151   :  { %402 = vst [vmem:[#allocation7 + $0xa8] sm:$0xff] %v377_v15  ;;  %v353_v19 = vmul.f32 0.5, %v660_v17  ;;  %669 = vtanh.f32 %v293_v16 }
 0x152   :  { %v365_v20 = vadd.f32 0.5, %v340_v18 }
 0x153   :  { %v662_v21 = vpop.eup %661  ;;  %v378_v22 = vadd.f32 0.5, %v353_v19 }
 0x154   :  { %v664_v23 = vpop.eup %663  ;;  %390 = vst [vmem:[#allocation7 + $0x48] sm:$0xff] %v365_v20  ;;  %v341_v24 = vmul.f32 0.5, %v662_v21 }
 0x155   :  { %403 = vst [vmem:[#allocation7 + $0xb0] sm:$0xff] %v378_v22  ;;  %v354_v51 = vmul.f32 0.5, %v664_v23 }
 0x156   :  { %v366_v25 = vadd.f32 0.5, %v341_v24 }
 0x157   :  { %v666_v26 = vpop.eup %665  ;;  %v379_v27 = vadd.f32 0.5, %v354_v51 }
 0x158   :  { %v668_v28 = vpop.eup %667  ;;  %391 = vst [vmem:[#allocation7 + $0x50] sm:$0xff] %v366_v25  ;;  %v342_v29 = vmul.f32 0.5, %v666_v26 }
 0x159   :  { %404 = vst [vmem:[#allocation7 + $0xb8] sm:$0xff] %v379_v27  ;;  %v355_v30 = vmul.f32 0.5, %v668_v28 }
 0x15a   :  { %v367_v31 = vadd.f32 0.5, %v342_v29 }
 0x15b   :  { %v670_v32 = vpop.eup %669  ;;  %v380_v33 = vadd.f32 0.5, %v355_v30 }
 0x15c   :  { %392 = vst [vmem:[#allocation7 + $0x58] sm:$0xff] %v367_v31  ;;  %v343_v34 = vmul.f32 0.5, %v670_v32 }
 0x15d   :  { %405 = vst [vmem:[#allocation7 + $0xc0] sm:$0xff] %v380_v33 }
 0x15e   :  { %v368_v35 = vadd.f32 0.5, %v343_v34 }
 0x160   :  { %393 = vst [vmem:[#allocation7 + $0x60] sm:$0xff] %v368_v35 }
 0x161   :  { %726 = shalt.err (!%p723_p6)
}
 0x162   :  { %s727_s15 = scalar_lea.hbm %s899_s3, 3200 }
 0x163   :  { %p728_p7 = scmp.ne.s32.totalorder %s899_s3, %s727_s15  ;;  %p731_p8 = scmp.lt.u32.totalorder %s727_s15, %s899_s3 }
 0x165   :  { %p733_p9 = pnand %p731_p8, %p728_p7 }
 0x167   :  { %736 = shalt.err (!%p733_p9)
}
 0x168   :  { %417 = dma.vmem_to_hbm [thread:$0]  %s412_s11, 3200, %s899_s3, [#allocation4], %s744_s22, %s744_s22, %s745_s23  }
 0x169   :  { %741 = dma.done.wait [#allocation4], 3200  }
 0x16a   :  { %742 = vsyncadd [#allocation4], 4294964096 }
 0x16b   :  { %421 = vsyncpa [#allocation3], 1 }
 0x16c   :  { %422 = vsyncpa [#allocation6], 1 }
 0x16d   :  { %423 = vsyncpa [#allocation4], 1 }

</bundles_post_ra>
